<compile_context>
chip_gen: v7x
topology: tpu7x:2x2x1
jax: 0.10.0
libtpu: 0.0.40
codegen_flags: <defaults>
</compile_context>

<pallas_src>
import functools
import math

import jax
import jax.numpy as jnp
from jax.experimental import pallas as pl
from jax.experimental.pallas import tpu as pltpu

LANES = 128
SUBLANES = 8
MAX_TILE_ROWS = 512  # (512,128) f32 = 256 KiB/stream/buffer; 6 streams x 2 bufs ~ 3 MiB


def _haversine_kernel(plon_ref, plat_ref, tlon_ref, tlat_ref, *rest,
                      eps, earth_radius, n, tile_rows, has_weight):
    if has_weight:
        w_ref, out_ref = rest
    else:
        (out_ref,) = rest

    rad = math.pi / 180.0
    plon = plon_ref[...] * rad          # (tile_rows, 128), all lanes/sublanes dense
    plat = plat_ref[...] * rad
    tlon = tlon_ref[...] * rad
    tlat = tlat_ref[...] * rad

    dlon = plon - tlon
    dlat = plat - tlat

    sin_dlat = jnp.sin(dlat * 0.5)
    sin_dlon = jnp.sin(dlon * 0.5)
    # NB: matches the PyTorch reference exactly — cosines are taken on column 0
    # (the lon column in the reference code), faithfully replicating it.
    a = sin_dlat * sin_dlat + jnp.cos(tlon) * jnp.cos(plon) * sin_dlon * sin_dlon

    # atan2(sqrt(a+eps), sqrt(1-a+eps)) with both args >= 0
    #   == atan(sqrt((a+eps) / (1-a+eps)))
    # one sqrt + approx EUP reciprocal instead of two sqrts; atan via atan2(x, 1).
    ratio = (a + eps) * pl.reciprocal(1.0 - a + eps, approx=True)
    sqrt_ratio = jnp.sqrt(ratio)
    c = 2.0 * jnp.arctan2(sqrt_ratio, jnp.ones_like(sqrt_ratio))
    loss = earth_radius * c

    if has_weight:
        loss = loss * w_ref[...]

    # Mask padded samples to +inf so they never perturb the lower median.
    row = jax.lax.broadcasted_iota(jnp.int32, loss.shape, 0)
    lane = jax.lax.broadcasted_iota(jnp.int32, loss.shape, 1)
    gidx = (pl.program_id(0) * tile_rows + row) * LANES + lane
    out_ref[...] = jnp.where(gidx < n, loss, jnp.float32(jnp.inf))


def weighted_haversine_loss(predictions, targets, sample_weight=None,
                            eps=1e-6, earth_radius=6371.0):
    """predictions, targets: (N, 2) float32 [lon, lat]; sample_weight: (N,) or None.

    Returns the scalar lower median of the (weighted) per-sample haversine losses,
    matching torch.Tensor.median() semantics.
    """
    predictions = jnp.asarray(predictions, jnp.float32)
    targets = jnp.asarray(targets, jnp.float32)
    n = predictions.shape[0]

    # Pad the sample axis so the lane dim is a full 128 and the row dim is a
    # multiple of 8 (vreg tiling) and of the chosen tile.
    rows = pl.cdiv(n, LANES)
    rows = pl.cdiv(rows, SUBLANES) * SUBLANES
    tile_rows = min(MAX_TILE_ROWS, rows)
    rows = pl.cdiv(rows, tile_rows) * tile_rows
    n_pad = rows * LANES
    grid = (rows // tile_rows,)

    def slab(col):
        col = jnp.asarray(col, jnp.float32).reshape(n)
        return jnp.pad(col, (0, n_pad - n)).reshape(rows, LANES)

    # Deinterleave (N,2) columns into lane-dense per-channel slabs (one layout pass).
    streams = [slab(predictions[:, 0]), slab(predictions[:, 1]),
               slab(targets[:, 0]), slab(targets[:, 1])]
    has_weight = sample_weight is not None
    if has_weight:
        streams.append(slab(sample_weight))

    spec = pl.BlockSpec((tile_rows, LANES), lambda i: (i, 0))
    kernel = functools.partial(
        _haversine_kernel, eps=float(eps), earth_radius=float(earth_radius),
        n=n, tile_rows=tile_rows, has_weight=has_weight)

    per_sample = pl.pallas_call(
        kernel,
        out_shape=jax.ShapeDtypeStruct((rows, LANES), jnp.float32),
        grid=grid,
        in_specs=[spec] * len(streams),
        out_specs=spec,
        compiler_params=pltpu.CompilerParams(dimension_semantics=("parallel",)),
    )(*streams)

    # TODO(synk): median is a sort-based reduction with no clean Pallas/Mosaic sort
    # primitive; done in plain JAX (lower median over the original n samples —
    # padding is +inf so it sorts past every real sample).
    flat = per_sample.reshape(-1)
    return jnp.sort(flat)[(n - 1) // 2]


def _reference_loss(predictions, targets, sample_weight=None,
                    eps=1e-6, earth_radius=6371.0):
    """Pure-JAX replica of the PyTorch reference, for a tolerance check."""
    rad = math.pi / 180.0
    p = jnp.asarray(predictions, jnp.float32) * rad
    t = jnp.asarray(targets, jnp.float32) * rad
    dlon = p[:, 0] - t[:, 0]
    dlat = p[:, 1] - t[:, 1]
    a = jnp.sin(dlat / 2) ** 2 + jnp.cos(t[:, 0]) * jnp.cos(p[:, 0]) * jnp.sin(dlon / 2) ** 2
    c = 2.0 * jnp.arctan2(jnp.sqrt(a + eps), jnp.sqrt(1.0 - a + eps))
    loss = earth_radius * c
    if sample_weight is not None:
        loss = loss * jnp.asarray(sample_weight, jnp.float32)
    n = loss.shape[0]
    return jnp.sort(loss)[(n - 1) // 2]


if __name__ == "__main__":
    key = jax.random.PRNGKey(0)
    k1, k2, k3 = jax.random.split(key, 3)

    N = 8  # small batch of (lon, lat) pairs, as the module's forward implies
    predictions = jax.random.uniform(k1, (N, 2), jnp.float32, minval=-90.0, maxval=90.0)
    targets = jax.random.uniform(k2, (N, 2), jnp.float32, minval=-90.0, maxval=90.0)
    sample_weight = jax.random.uniform(k3, (N,), jnp.float32, minval=0.5, maxval=1.5)

    out_w = weighted_haversine_loss(predictions, targets, sample_weight)
    out_nw = weighted_haversine_loss(predictions, targets)  # weight-less kernel variant
    jax.block_until_ready((out_w, out_nw))

    # Loose tolerance check vs. the reference (approx reciprocal introduces a tiny
    # relative error; anything structural — wrong column, bad masking — would blow this).
    ref_w = float(_reference_loss(predictions, targets, sample_weight))
    ref_nw = float(_reference_loss(predictions, targets))
    assert abs(float(out_w) - ref_w) <= 2e-2 * abs(ref_w) + 1e-2, (float(out_w), ref_w)
    assert abs(float(out_nw) - ref_nw) <= 2e-2 * abs(ref_nw) + 1e-2, (float(out_nw), ref_nw)

    print("KERNEL_OK")
</pallas_src>

<mosaic_0001>
module attributes {stable_mosaic.version = 11 : i64} {
  func.func @_haversine_kernel(%arg0: i32, %arg1: memref<8x128xf32, #tpu.memory_space<vmem>>, %arg2: memref<8x128xf32, #tpu.memory_space<vmem>>, %arg3: memref<8x128xf32, #tpu.memory_space<vmem>>, %arg4: memref<8x128xf32, #tpu.memory_space<vmem>>, %arg5: memref<8x128xf32, #tpu.memory_space<vmem>>, %arg6: memref<8x128xf32, #tpu.memory_space<vmem>>) attributes {dimension_semantics = [#tpu.dimension_semantics<parallel>], iteration_bounds = array<i64: 1>, scalar_prefetch = 0 : i64, scratch_operands = 0 : i64, tpu.core_type = #tpu.core_type<tc>, window_params = [{transform_indices = @transform_0, window_bounds = array<i64: 8, 128>}, {transform_indices = @transform_1, window_bounds = array<i64: 8, 128>}, {transform_indices = @transform_2, window_bounds = array<i64: 8, 128>}, {transform_indices = @transform_3, window_bounds = array<i64: 8, 128>}, {transform_indices = @transform_4, window_bounds = array<i64: 8, 128>}, {transform_indices = @transform_5, window_bounds = array<i64: 8, 128>}]} {
    %c0 = arith.constant 0 : index
    %c0_0 = arith.constant 0 : index
    %0 = vector.load %arg1[%c0, %c0_0] : memref<8x128xf32, #tpu.memory_space<vmem>>, vector<8x128xf32>
    %cst = arith.constant 0.0174532924 : f32
    %1 = vector.broadcast %cst : f32 to vector<8x128xf32>
    %2 = arith.mulf %0, %1 : vector<8x128xf32>
    %c0_1 = arith.constant 0 : index
    %c0_2 = arith.constant 0 : index
    %3 = vector.load %arg2[%c0_1, %c0_2] : memref<8x128xf32, #tpu.memory_space<vmem>>, vector<8x128xf32>
    %cst_3 = arith.constant 0.0174532924 : f32
    %4 = vector.broadcast %cst_3 : f32 to vector<8x128xf32>
    %5 = arith.mulf %3, %4 : vector<8x128xf32>
    %c0_4 = arith.constant 0 : index
    %c0_5 = arith.constant 0 : index
    %6 = vector.load %arg3[%c0_4, %c0_5] : memref<8x128xf32, #tpu.memory_space<vmem>>, vector<8x128xf32>
    %cst_6 = arith.constant 0.0174532924 : f32
    %7 = vector.broadcast %cst_6 : f32 to vector<8x128xf32>
    %8 = arith.mulf %6, %7 : vector<8x128xf32>
    %c0_7 = arith.constant 0 : index
    %c0_8 = arith.constant 0 : index
    %9 = vector.load %arg4[%c0_7, %c0_8] : memref<8x128xf32, #tpu.memory_space<vmem>>, vector<8x128xf32>
    %cst_9 = arith.constant 0.0174532924 : f32
    %10 = vector.broadcast %cst_9 : f32 to vector<8x128xf32>
    %11 = arith.mulf %9, %10 : vector<8x128xf32>
    %12 = arith.subf %2, %8 : vector<8x128xf32>
    %13 = arith.subf %5, %11 : vector<8x128xf32>
    %cst_10 = arith.constant 5.000000e-01 : f32
    %14 = vector.broadcast %cst_10 : f32 to vector<8x128xf32>
    %15 = arith.mulf %13, %14 : vector<8x128xf32>
    %16 = math.sin %15 : vector<8x128xf32>
    %cst_11 = arith.constant 5.000000e-01 : f32
    %17 = vector.broadcast %cst_11 : f32 to vector<8x128xf32>
    %18 = arith.mulf %12, %17 : vector<8x128xf32>
    %19 = math.sin %18 : vector<8x128xf32>
    %20 = arith.mulf %16, %16 : vector<8x128xf32>
    %21 = math.cos %8 : vector<8x128xf32>
    %22 = math.cos %2 : vector<8x128xf32>
    %23 = arith.mulf %21, %22 : vector<8x128xf32>
    %24 = arith.mulf %23, %19 : vector<8x128xf32>
    %25 = arith.mulf %24, %19 : vector<8x128xf32>
    %26 = arith.addf %20, %25 : vector<8x128xf32>
    %cst_12 = arith.constant 9.99999997E-7 : f32
    %27 = vector.broadcast %cst_12 : f32 to vector<8x128xf32>
    %28 = arith.addf %26, %27 : vector<8x128xf32>
    %cst_13 = arith.constant 1.000000e+00 : f32
    %29 = vector.broadcast %cst_13 : f32 to vector<8x128xf32>
    %30 = arith.subf %29, %26 : vector<8x128xf32>
    %cst_14 = arith.constant 9.99999997E-7 : f32
    %31 = vector.broadcast %cst_14 : f32 to vector<8x128xf32>
    %32 = arith.addf %30, %31 : vector<8x128xf32>
    %33 = tpu.reciprocal %32 {approx = true} : vector<8x128xf32> -> vector<8x128xf32>
    %34 = arith.mulf %28, %33 : vector<8x128xf32>
    %35 = math.sqrt %34 : vector<8x128xf32>
    %cst_15 = arith.constant 1.000000e+00 : f32
    %36 = vector.broadcast %cst_15 : f32 to vector<8x128xf32>
    %37 = math.atan2 %35, %36 : vector<8x128xf32>
    %cst_16 = arith.constant 2.000000e+00 : f32
    %38 = vector.broadcast %cst_16 : f32 to vector<8x128xf32>
    %39 = arith.mulf %38, %37 : vector<8x128xf32>
    %cst_17 = arith.constant 6.371000e+03 : f32
    %40 = vector.broadcast %cst_17 : f32 to vector<8x128xf32>
    %41 = arith.mulf %40, %39 : vector<8x128xf32>
    %c0_18 = arith.constant 0 : index
    %c0_19 = arith.constant 0 : index
    %42 = vector.load %arg5[%c0_18, %c0_19] : memref<8x128xf32, #tpu.memory_space<vmem>>, vector<8x128xf32>
    %43 = arith.mulf %41, %42 : vector<8x128xf32>
    %44 = tpu.iota {dimensions = array<i32: 0>} : vector<8x128xi32>
    %45 = tpu.iota {dimensions = array<i32: 1>} : vector<8x128xi32>
    %c8_i32 = arith.constant 8 : i32
    %46 = arith.muli %arg0, %c8_i32 : i32
    %47 = vector.broadcast %46 : i32 to vector<8x128xi32>
    %48 = arith.addi %47, %44 : vector<8x128xi32>
    %c128_i32 = arith.constant 128 : i32
    %49 = vector.broadcast %c128_i32 : i32 to vector<8x128xi32>
    %50 = arith.muli %48, %49 : vector<8x128xi32>
    %51 = arith.addi %50, %45 : vector<8x128xi32>
    %c8_i32_20 = arith.constant 8 : i32
    %52 = vector.broadcast %c8_i32_20 : i32 to vector<8x128xi32>
    %53 = arith.cmpi slt, %51, %52 : vector<8x128xi32>
    %cst_21 = arith.constant 0x7F800000 : f32
    %54 = vector.broadcast %cst_21 : f32 to vector<8x128xf32>
    %55 = arith.select %53, %43, %54 : vector<8x128xi1>, vector<8x128xf32>
    %c0_22 = arith.constant 0 : index
    %c0_23 = arith.constant 0 : index
    %56 = vector.load %arg6[%c0_22, %c0_23] : memref<8x128xf32, #tpu.memory_space<vmem>>, vector<8x128xf32>
    tpu.vector_store %arg6[%c0_22, %c0_23], %55 {strides = array<i32>} : memref<8x128xf32, #tpu.memory_space<vmem>>, vector<8x128xf32>,
    return
  }
  func.func @transform_0(%arg0: i32) -> (i32, i32) {
    %c0_i32 = arith.constant 0 : i32
    %c0_i32_0 = arith.constant 0 : i32
    return %arg0, %c0_i32 : i32, i32
  }
  func.func @transform_1(%arg0: i32) -> (i32, i32) {
    %c0_i32 = arith.constant 0 : i32
    %c0_i32_0 = arith.constant 0 : i32
    return %arg0, %c0_i32 : i32, i32
  }
  func.func @transform_2(%arg0: i32) -> (i32, i32) {
    %c0_i32 = arith.constant 0 : i32
    %c0_i32_0 = arith.constant 0 : i32
    return %arg0, %c0_i32 : i32, i32
  }
  func.func @transform_3(%arg0: i32) -> (i32, i32) {
    %c0_i32 = arith.constant 0 : i32
    %c0_i32_0 = arith.constant 0 : i32
    return %arg0, %c0_i32 : i32, i32
  }
  func.func @transform_4(%arg0: i32) -> (i32, i32) {
    %c0_i32 = arith.constant 0 : i32
    %c0_i32_0 = arith.constant 0 : i32
    return %arg0, %c0_i32 : i32, i32
  }
  func.func @transform_5(%arg0: i32) -> (i32, i32) {
    %c0_i32 = arith.constant 0 : i32
    %c0_i32_0 = arith.constant 0 : i32
    return %arg0, %c0_i32 : i32, i32
  }
}

</mosaic_0001>

<bundles_post_ra>
// kernel: tpu_custom_call.1
= control target key start
LH: loop header
LB: loop body
LE: loop exit
PB: predicated region body
PF: predicated region fallthrough
CT: control target
= control target key end

     0   :  { %10 = vsyncpa [#allocation3], 0  ;;  %s1193_s0 = inlined_call_operand.hbm [shape: f32[8,128], index: 0, kind: input, shape index: {}]   ;;  %s1194_s1 = inlined_call_operand.hbm [shape: f32[8,128], index: 1, kind: input, shape index: {}]   ;;  %s1195_s2 = inlined_call_operand.hbm [shape: f32[8,128], index: 2, kind: input, shape index: {}]   ;;  %s1196_s3 = inlined_call_operand.vmem [shape: f32[8,128], index: 3, kind: input, shape index: {}]   ;;  %s1197_s4 = inlined_call_operand.hbm [shape: f32[8,128], index: 4, kind: input, shape index: {}]   ;;  %s1198_s5 = inlined_call_operand.hbm [shape: f32[8,128], index: 5, kind: output, shape index: {}]  }
   0x1   :  { %11 = vsyncpa [#allocation6], 0 }
   0x2   :  { %12 = vsyncpa [#allocation9], 0 }
   0x3   :  { %13 = vsyncpa [#allocation4], 0  ;;  %s764_s18 = smov [#allocation5]   ;;  %s765_s20 = smov [#allocation2]  }
   0x4   :  { %s30_s19 = sshll.u32 %s764_s18, 4  ;;  %s20_s21 = sshll.u32 %s765_s20, 4  ;;  %s31_s19 = int_to_ptr.vmem [resolvable:$true] %s30_s19  ;;  %s21_s21 = int_to_ptr.vmem [resolvable:$true] %s20_s21 }
   0x5   :  { %s646_s24 = scalar_lea.hbm %s1194_s1, 128 }
   0x6   :  { %p647_p0 = scmp.ne.s32.totalorder %s1194_s1, %s646_s24  ;;  %p650_p1 = scmp.lt.u32.totalorder %s646_s24, %s1194_s1 }
   0x8   :  { %p652_p2 = pnand %p650_p1, %p647_p0 }
   0xa   :  { %655 = shalt.err (!%p652_p2)
}
   0xb   :  { %s656_s29 = scalar_lea.vmem %s31_s19, 128  ;;  %p661_p4 = scmp.lt.s32.totalorder %s31_s19, %s31_s19 }
   0xc   :  { %p657_p3 = scmp.ne.s32.totalorder %s31_s19, %s656_s29  ;;  %p662_p5 = scmp.lt.s32.totalorder %s656_s29, %s656_s29 }
   0xe   :  { %p663_p6 = por %p662_p5, %p661_p4 }
  0x10   :  { %p664_p7 = pnand %p663_p6, %p657_p3 }
  0x12   :  { %667 = shalt.err (!%p664_p7)
}
  0x13   :  { %33 = dma.hbm_to_vmem [thread:$0]  %s1194_s1, 128, %s31_s19, [#allocation6]  }
  0x14   :  { %s668_s9 = scalar_lea.hbm %s1193_s0, 128 }
  0x15   :  { %p669_p8 = scmp.ne.s32.totalorder %s1193_s0, %s668_s9  ;;  %p672_p9 = scmp.lt.u32.totalorder %s668_s9, %s1193_s0 }
  0x17   :  { %p674_p10 = pnand %p672_p9, %p669_p8 }
  0x19   :  { %677 = shalt.err (!%p674_p10)
}
  0x1a   :  { %s678_s14 = scalar_lea.vmem %s21_s21, 128  ;;  %p683_p12 = scmp.lt.s32.totalorder %s21_s21, %s21_s21 }
  0x1b   :  { %p679_p11 = scmp.ne.s32.totalorder %s21_s21, %s678_s14  ;;  %p684_p13 = scmp.lt.s32.totalorder %s678_s14, %s678_s14 }
  0x1d   :  { %p685_p0 = por %p684_p13, %p683_p12 }
  0x1f   :  { %p686_p1 = pnand %p685_p0, %p679_p11 }
  0x21   :  { %689 = shalt.err (!%p686_p1)
}
  0x22   :  { %23 = dma.hbm_to_vmem [thread:$0]  %s1193_s0, 128, %s21_s21, [#allocation3]  }
  0x23   :  { %s766_s16 = smov [#allocation7]   ;;  %s767_s18 = smov [#allocation8]  }
  0x24   :  { %s40_s17 = sshll.u32 %s766_s16, 4  ;;  %s52_s19 = sshll.u32 %s767_s18, 4  ;;  %s41_s17 = int_to_ptr.vmem [resolvable:$true] %s40_s17  ;;  %s53_s19 = int_to_ptr.vmem [resolvable:$true] %s52_s19 }
  0x25   :  { %s690_s23 = scalar_lea.hbm %s1195_s2, 128 }
  0x26   :  { %p691_p2 = scmp.ne.s32.totalorder %s1195_s2, %s690_s23  ;;  %p694_p3 = scmp.lt.u32.totalorder %s690_s23, %s1195_s2 }
  0x28   :  { %p696_p4 = pnand %p694_p3, %p691_p2 }
  0x2a   :  { %699 = shalt.err (!%p696_p4)
}
  0x2b   :  { %s700_s0 = scalar_lea.vmem %s41_s17, 128  ;;  %p705_p6 = scmp.lt.s32.totalorder %s41_s17, %s41_s17 }
  0x2c   :  { %p701_p5 = scmp.ne.s32.totalorder %s41_s17, %s700_s0  ;;  %p706_p7 = scmp.lt.s32.totalorder %s700_s0, %s700_s0 }
  0x2e   :  { %p707_p8 = por %p706_p7, %p705_p6 }
  0x30   :  { %p708_p9 = pnand %p707_p8, %p701_p5 }
  0x32   :  { %711 = shalt.err (!%p708_p9)
}
  0x33   :  { %43 = dma.hbm_to_vmem [thread:$0]  %s1195_s2, 128, %s41_s17, [#allocation6]  }
  0x34   :  { %s712_s6 = scalar_lea.hbm %s1197_s4, 128 }
  0x35   :  { %p713_p10 = scmp.ne.s32.totalorder %s1197_s4, %s712_s6  ;;  %p716_p11 = scmp.lt.u32.totalorder %s712_s6, %s1197_s4 }
  0x37   :  { %p718_p12 = pnand %p716_p11, %p713_p10 }
  0x39   :  { %721 = shalt.err (!%p718_p12)
}
  0x3a   :  { %s722_s11 = scalar_lea.vmem %s53_s19, 128  ;;  %p727_p0 = scmp.lt.s32.totalorder %s53_s19, %s53_s19 }
  0x3b   :  { %p723_p13 = scmp.ne.s32.totalorder %s53_s19, %s722_s11  ;;  %p728_p1 = scmp.lt.s32.totalorder %s722_s11, %s722_s11 }
  0x3d   :  { %p729_p2 = por %p728_p1, %p727_p0 }
  0x3f   :  { %p730_p3 = pnand %p729_p2, %p723_p13 }
  0x41   :  { %733 = shalt.err (!%p730_p3)
}
  0x42   :  { %55 = dma.hbm_to_vmem [thread:$0]  %s1197_s4, 128, %s53_s19, [#allocation9]  }
  0x43   :  { %756 = dma.done.wait [#allocation3], 128  }
  0x44   :  { %757 = vsyncadd [#allocation3], 4294967168 }
  0x45   :  { %758 = dma.done.wait [#allocation6], 256  }
  0x46   :  { %759 = vsyncadd [#allocation6], 4294967040 }
  0x47   :  { %760 = dma.done.wait [#allocation9], 128  }
  0x48   :  { %761 = vsyncadd [#allocation9], 4294967168  ;;  %v68_v0 = vld [vmem:[#allocation2] sm:$0xff]  ;;  %v70_v1 = vld [vmem:[#allocation5] sm:$0xff]  ;;  %v768_v43 = vmov 683565275  }
  0x49   :  { %v72_v2 = vld [vmem:[#allocation7] sm:$0xff]  ;;  %v853_v3 = vmul.f32 0.017453292, %v68_v0  ;;  %v71_v4 = vmul.f32 0.017453292, %v70_v1  ;;  %v74_v6 = vld [vmem:[%s1196_s3] sm:$0xff] }
  0x4a   :  { %v855_v5 = vmul.f32 0.017453292, %v72_v2  ;;  %v75_v7 = vmul.f32 0.017453292, %v74_v6  ;;  %v769_v47 = vmov 2475754826  }
  0x4b   :  { %v395_v27 = vand.u32 2139095040, %v853_v3  ;;  %v770_v49 = vmov 2102212464   ;;  %v771_v58 = vmov 2131351028   ;;  %s774_s3 = smov [#allocation10]  }
  0x4c   :  { %v76_v8 = vsub.f32 %v853_v3, %v855_v5  ;;  %v292_v9 = vand.u32 2139095040, %v855_v5  ;;  %v77_v10 = vsub.f32 %v71_v4, %v75_v7  ;;  %v289_v24 = vand.u32 2147483647, %v855_v5  ;;  %s570_s4 = sshll.u32 %s774_s3, 4  ;;  %s571_s4 = int_to_ptr.vmem [resolvable:$true] %s570_s4 }
  0x4d   :  { %v885_v36 = vshrl.u32 %v395_v27, 23  ;;  %v772_v61 = vmov 920167782   ;;  %v773_v7 = vmov 1326507024   ;;  %s734_s1 = scalar_lea.vmem %s571_s4, 128  ;;  %p739_p5 = scmp.lt.s32.totalorder %s571_s4, %s571_s4 }
  0x4e   :  { %v863_v11 = vmul.f32 0.5, %v76_v8  ;;  %v293_v12 = vshrl.u32 %v292_v9, 23  ;;  %v865_v13 = vmul.f32 0.5, %v77_v10  ;;  %v883_v35 = vand.u32 8388607, %v289_v24  ;;  %p735_p4 = scmp.ne.s32.totalorder %s571_s4, %s734_s1  ;;  %p740_p6 = scmp.lt.s32.totalorder %s734_s1, %s734_s1 }
  0x50   :  { %v184_v14 = vand.u32 2147483647, %v863_v11  ;;  %v187_v15 = vand.u32 2139095040, %v863_v11  ;;  %v589_v16 = vadd.s32 4294967169, %v293_v12  ;;  %v79_v17 = vand.u32 2147483647, %v865_v13  ;;  %p741_p7 = por %p740_p6, %p739_p5 }
  0x51   :  { %v82_v18 = vand.u32 2139095040, %v865_v13 }
  0x52   :  { %v188_v19 = vshrl.u32 %v187_v15, 23  ;;  %v191_v20 = vand.u32 8388607, %v184_v14  ;;  %v299_v21 = vadd.s32 1, %v589_v16  ;;  %v86_v23 = vand.u32 8388607, %v79_v17  ;;  %p742_p8 = pnand %p741_p7, %p735_p4 }
  0x53   :  { %v83_v22 = vshrl.u32 %v82_v18, 23 }
  0x54   :  { %v585_v25 = vadd.s32 4294967169, %v188_v19  ;;  %v192_v26 = vor.u32 8388608, %v191_v20  ;;  %vm300_vm0 = vcmp.gt.s32.totalorder %v299_v21, 0  ;;  %v87_v29 = vor.u32 8388608, %v86_v23 }
  0x55   :  { %v581_v28 = vadd.s32 4294967169, %v83_v22  ;;  %v301_v30 = vsel %vm300_vm0, %v299_v21, 0 }
  0x56   :  { %v194_v31 = vadd.s32 1, %v585_v25  ;;  %v877_v32 = vand.u32 31, %v301_v30  ;;  %v879_v34 = vshll.u32 %v192_v26, 8  ;;  %v887_v37 = vshll.u32 %v87_v29, 8 }
  0x57   :  { %v89_v33 = vadd.s32 1, %v581_v28  ;;  %v889_v39 = vshrl.u32 %v301_v30, 5 }
  0x58   :  { %vm195_vm1 = vcmp.gt.s32.totalorder %v194_v31, 0  ;;  %v892_v42 = vsub.s32 32, %v877_v32  ;;  %v896_v44 = vshll.u32 %v768_v43, %v877_v32  ;;  %v900_v48 = vshll.u32 %v769_v47, %v877_v32 }
  0x59   :  { %vm90_vm2 = vcmp.gt.s32.totalorder %v89_v33, 0  ;;  %v196_v38 = vsel %vm195_vm1, %v194_v31, 0  ;;  %v904_v50 = vshll.u32 %v770_v49, %v877_v32  ;;  %vm321_vm13 = vcmp.lt.s32.totalorder %v889_v39, 1 }
  0x5a   :  { %v91_v40 = vsel %vm90_vm2, %v89_v33, 0  ;;  %v198_v41 = vand.u32 31, %v196_v38  ;;  %v906_v51 = vshrl.u32 %v196_v38, 5  ;;  %vm324_vm14 = vcmp.lt.s32.totalorder %v889_v39, 4 }
  0x5b   :  { %v92_v45 = vshrl.u32 %v91_v40, 5  ;;  %v93_v46 = vand.u32 31, %v91_v40  ;;  %vm323_vm15 = vcmp.lt.s32.totalorder %v889_v39, 3  ;;  %vm322_vm0 = vcmp.lt.s32.totalorder %v889_v39, 2 }
  0x5c   :  { %v199_v52 = vsub.s32 32, %v198_v41  ;;  %v201_v53 = vshll.u32 %v768_v43, %v198_v41  ;;  %v204_v54 = vshll.u32 %v769_v47, %v198_v41  ;;  %v207_v63 = vshll.u32 %v771_v58, %v198_v41 }
  0x5d   :  { %v94_v55 = vsub.s32 32, %v93_v46  ;;  %v96_v56 = vshll.u32 %v768_v43, %v93_v46  ;;  %v99_v57 = vshll.u32 %v769_v47, %v93_v46  ;;  %v102_v59 = vshll.u32 %v771_v58, %v93_v46 }
  0x5e   :  { %v105_v60 = vshll.u32 %v770_v49, %v93_v46  ;;  %v108_v62 = vshll.u32 %v772_v61, %v93_v46  ;;  %vm111_vm3 = vcmp.lt.s32.totalorder %v92_v45, 1  ;;  %vm112_vm4 = vcmp.lt.s32.totalorder %v92_v45, 2 }
  0x5f   :  { %v95_v0 = vshrl.u32 %v768_v43, %v94_v55  ;;  %v97_v1 = vshrl.u32 %v769_v47, %v94_v55  ;;  %v100_v2 = vshrl.u32 %v771_v58, %v94_v55  ;;  %v103_v4 = vshrl.u32 %v770_v49, %v94_v55 }
  0x60   :  { %v106_v6 = vshrl.u32 %v772_v61, %v94_v55  ;;  %v109_v8 = vshrl.u32 %v773_v7, %v94_v55  ;;  %vm113_vm5 = vcmp.lt.s32.totalorder %v92_v45, 3  ;;  %vm114_vm6 = vcmp.lt.s32.totalorder %v92_v45, 4 }
  0x61   :  { %v98_v9 = vor.u32 %v97_v1, %v96_v56  ;;  %v101_v10 = vor.u32 %v100_v2, %v99_v57  ;;  %v104_v12 = vor.u32 %v103_v4, %v102_v59  ;;  %v202_v18 = vshrl.u32 %v769_v47, %v199_v52 }
  0x62   :  { %v107_v15 = vor.u32 %v106_v6, %v105_v60  ;;  %v110_v16 = vor.u32 %v109_v8, %v108_v62  ;;  %v205_v19 = vshrl.u32 %v771_v58, %v199_v52  ;;  %v200_v28 = vshrl.u32 %v768_v43, %v199_v52 }
  0x63   :  { %v115_v20 = vsel %vm111_vm3, %v95_v0, %v98_v9  ;;  %v116_v21 = vsel %vm114_vm6, %v104_v12, 2102212464  ;;  %v119_v22 = vsel %vm111_vm3, %v98_v9, %v101_v10  ;;  %v123_v23 = vsel %vm111_vm3, %v101_v10, %v104_v12 }
  0x64   :  { %v117_v25 = vsel %vm113_vm5, %v101_v10, %v116_v21  ;;  %v120_v26 = vsel %vm114_vm6, %v107_v15, 920167782  ;;  %v124_v27 = vsel %vm114_vm6, %v110_v16, 1326507024  ;;  %v203_v33 = vor.u32 %v202_v18, %v201_v53 }
  0x65   :  { %v118_v29 = vsel %vm112_vm4, %v115_v20, %v117_v25  ;;  %v121_v30 = vsel %vm113_vm5, %v104_v12, %v120_v26  ;;  %v125_v31 = vsel %vm113_vm5, %v107_v15, %v124_v27  ;;  %v206_v46 = vor.u32 %v205_v19, %v204_v54 }
  0x66   :  { %v122_v38 = vsel %vm112_vm4, %v119_v22, %v121_v30  ;;  %v126_v40 = vsel %vm112_vm4, %v123_v23, %v125_v31  ;;  %v208_v55 = vshrl.u32 %v770_v49, %v199_v52  ;;  %v210_v0 = vshll.u32 %v770_v49, %v198_v41 }
  0x67   :  { %v936_v56 = vmul.u32.u64.low %v887_v37, %v126_v40  ;;  %v937_v57 = vmul.u32.u64.high %v887_v37, %v126_v40, %v936_v56  ;;  %v940_v59 = vmul.u32.u64.low %v887_v37, %v122_v38  ;;  %v941_v60 = vmul.u32.u64.high %v887_v37, %v122_v38, %v940_v59 }
  0x68   :  { %v209_v62 = vor.u32 %v208_v55, %v207_v63  ;;  %v211_v53 = vshrl.u32 %v772_v61, %v199_v52  ;;  %v213_v45 = vshll.u32 %v772_v61, %v198_v41  ;;  %v134_v54 = vmul.u32 %v887_v37, %v118_v29 }
  0x69   :  { %v214_v1 = vshrl.u32 %v773_v7, %v199_v52  ;;  %vm216_vm7 = vcmp.lt.s32.totalorder %v906_v51, 1  ;;  %v307_v2 = vshrl.u32 %v769_v47, %v892_v42  ;;  %vm217_vm8 = vcmp.lt.s32.totalorder %v906_v51, 2 }
  0x6a   :  { %v212_v4 = vor.u32 %v211_v53, %v210_v0  ;;  %vm218_vm9 = vcmp.lt.s32.totalorder %v906_v51, 3  ;;  %vm219_vm10 = vcmp.lt.s32.totalorder %v906_v51, 4  ;;  %vm136_vm11 = vc.u32 %v937_v57, %v940_v59 }
  0x6b   :  { %v137_v41 = vadd.s32 1, %v941_v60  ;;  %v215_v37 = vor.u32 %v214_v1, %v213_v45  ;;  %v224_v63 = vsel %vm216_vm7, %v203_v33, %v206_v46  ;;  %v220_v52 = vsel %vm216_vm7, %v200_v28, %v203_v33 }
  0x6c   :  { %v221_v6 = vsel %vm219_vm10, %v209_v62, 2102212464  ;;  %v225_v8 = vsel %vm219_vm10, %v212_v4, 920167782  ;;  %v228_v9 = vsel %vm216_vm7, %v206_v46, %v209_v62  ;;  %v310_v21 = vshrl.u32 %v771_v58, %v892_v42 }
  0x6d   :  { %v138_v10 = vsel %vm136_vm11, %v137_v41, %v941_v60  ;;  %v222_v12 = vsel %vm218_vm9, %v206_v46, %v221_v6  ;;  %v226_v15 = vsel %vm218_vm9, %v209_v62, %v225_v8  ;;  %v229_v16 = vsel %vm219_vm10, %v215_v37, 1326507024 }
  0x6e   :  { %v139_v18 = vadd.s32 %v138_v10, %v134_v54  ;;  %v227_v19 = vsel %vm217_vm8, %v224_v63, %v226_v15  ;;  %v230_v20 = vsel %vm218_vm9, %v212_v4, %v229_v16  ;;  %v223_v22 = vsel %vm217_vm8, %v220_v52, %v222_v12 }
  0x6f   :  { %v231_v23 = vsel %vm217_vm8, %v228_v9, %v230_v20  ;;  %v974_v25 = vmul.u32.u64.low %v879_v34, %v227_v19  ;;  %v975_v26 = vmul.u32.u64.high %v879_v34, %v227_v19, %v974_v25  ;;  %v312_v30 = vshll.u32 %v771_v58, %v877_v32 }
  0x70   :  { %v140_v27 = vadd.s32 536870912, %v139_v18  ;;  %v979_v28 = vmul.u32.u64.low %v879_v34, %v231_v23  ;;  %v980_v29 = vmul.u32.u64.high %v879_v34, %v231_v23, %v979_v28  ;;  %v313_v31 = vshrl.u32 %v770_v49, %v892_v42 }
  0x71   :  { %v316_v51 = vshrl.u32 %v772_v61, %v892_v42  ;;  %v318_v33 = vshll.u32 %v772_v61, %v877_v32  ;;  %v319_v38 = vshrl.u32 %v773_v7, %v892_v42  ;;  %v239_v46 = vmul.u32 %v879_v34, %v223_v22 }
  0x72   :  { %v992_v40 = vshrl.u32 %v140_v27, 30  ;;  %v297_v55 = vor.u32 8388608, %v883_v35  ;;  %v242_v56 = vadd.s32 1, %v975_v26  ;;  %v308_v60 = vor.u32 %v307_v2, %v896_v44 }
  0x73   :  { %v311_v62 = vor.u32 %v310_v21, %v900_v48  ;;  %v317_v0 = vor.u32 %v316_v51, %v904_v50  ;;  %vm241_vm12 = vc.u32 %v980_v29, %v974_v25  ;;  %v593_v32 = vadd.s32 4294967169, %v885_v36 }
  0x74   :  { %v142_v53 = vshll.u32 %v992_v40, 30  ;;  %v243_v34 = vsel %vm241_vm12, %v242_v56, %v975_v26  ;;  %v314_v35 = vor.u32 %v313_v31, %v312_v30  ;;  %v320_v45 = vor.u32 %v319_v38, %v318_v33 }
  0x75   :  { %v244_v48 = vadd.s32 %v243_v34, %v239_v46  ;;  %v329_v50 = vsel %vm321_vm13, %v308_v60, %v311_v62  ;;  %v330_v54 = vsel %vm324_vm14, %v317_v0, 920167782  ;;  %v337_v1 = vshll.u32 %v297_v55, 8 }
  0x76   :  { %v1007_v44 = vsub.s32 %v139_v18, %v142_v53  ;;  %v305_v36 = vshrl.u32 %v768_v43, %v892_v42  ;;  %v326_v4 = vsel %vm324_vm14, %v314_v35, 2102212464  ;;  %v331_v41 = vsel %vm323_vm15, %v314_v35, %v330_v54 }
  0x77   :  { %v245_v2 = vadd.s32 536870912, %v244_v48  ;;  %v334_v37 = vsel %vm324_vm14, %v320_v45, 1326507024  ;;  %v402_v63 = vadd.s32 1, %v593_v32  ;;  %v332_v8 = vsel %vm322_vm0, %v329_v50, %v331_v41 }
  0x78   :  { %v145_v52 = vsub.s32 0, %v1007_v44  ;;  %v333_v9 = vsel %vm321_vm13, %v311_v62, %v314_v35  ;;  %v335_v10 = vsel %vm323_vm15, %v317_v0, %v334_v37  ;;  %v325_v15 = vsel %vm321_vm13, %v305_v36, %v308_v60 }
  0x79   :  { %v1018_v6 = vshrl.u32 %v245_v2, 30  ;;  %v1026_v42 = vmul.u32.u64.low %v337_v1, %v332_v8  ;;  %v1027_v12 = vmul.u32.u64.high %v337_v1, %v332_v8, %v1026_v42  ;;  %v327_v16 = vsel %vm323_vm15, %v311_v62, %v326_v4 }
  0x7a   :  { %v336_v19 = vsel %vm322_vm0, %v333_v9, %v335_v10  ;;  %vm403_vm1 = vcmp.gt.s32.totalorder %v402_v63, 0  ;;  %v582_v20 = vmin.u32 %v145_v52, %v1007_v44  ;;  %v328_v26 = vsel %vm322_vm0, %v325_v15, %v327_v16 }
  0x7b   :  { %v247_v18 = vshll.u32 %v1018_v6, 30  ;;  %v1038_v21 = vmul.u32.u64.low %v337_v1, %v336_v19  ;;  %v1039_v22 = vmul.u32.u64.high %v337_v1, %v336_v19, %v1038_v21  ;;  %v347_v27 = vadd.s32 1, %v1027_v12 }
  0x7c   :  { %v404_v28 = vsel %vm403_vm1, %v402_v63, 0  ;;  %v147_v30 = vclz %v582_v20  ;;  %v344_v31 = vmul.u32 %v337_v1, %v328_v26  ;;  %v392_v46 = vand.u32 2147483647, %v853_v3 }
  0x7d   :  { %v1041_v23 = vsub.s32 %v244_v48, %v247_v18  ;;  %vm346_vm2 = vc.u32 %v1039_v22, %v1026_v42  ;;  %v406_v33 = vand.u32 31, %v404_v28  ;;  %v405_v41 = vshrl.u32 %v404_v28, 5 }
  0x7e   :  { %v348_v38 = vsel %vm346_vm2, %v347_v27, %v1027_v12  ;;  %v583_v55 = vadd.s32 4294967294, %v147_v30  ;;  %v399_v0 = vand.u32 8388607, %v392_v46  ;;  %vm81_vm11 = vcmp.lt.s32.totalorder %v865_v13, 0 }
  0x7f   :  { %v250_v51 = vsub.s32 0, %v1041_v23  ;;  %v349_v56 = vadd.s32 %v348_v38, %v344_v31  ;;  %v407_v60 = vsub.s32 32, %v406_v33  ;;  %v409_v32 = vshll.u32 %v768_v43, %v406_v33 }
  0x80   :  { %vm584_vm3 = vcmp.lt.s32.totalorder %v583_v55, 0  ;;  %v412_v34 = vshll.u32 %v769_v47, %v406_v33  ;;  %v415_v50 = vshll.u32 %v771_v58, %v406_v33  ;;  %v418_v2 = vshll.u32 %v770_v49, %v406_v33 }
  0x81   :  { %v586_v39 = vmin.u32 %v250_v51, %v1041_v23  ;;  %v350_v62 = vadd.s32 536870912, %v349_v56  ;;  %v410_v45 = vshrl.u32 %v769_v47, %v407_v60  ;;  %v413_v48 = vshrl.u32 %v771_v58, %v407_v60 }
  0x82   :  { %v416_v1 = vshrl.u32 %v770_v49, %v407_v60  ;;  %v419_v36 = vshrl.u32 %v772_v61, %v407_v60  ;;  %v400_v4 = vor.u32 8388608, %v399_v0  ;;  %v421_v37 = vshll.u32 %v772_v61, %v406_v33 }
  0x83   :  { %v1054_v53 = vshrl.u32 %v350_v62, 30  ;;  %v252_v35 = vclz %v586_v39  ;;  %v422_v63 = vshrl.u32 %v773_v7, %v407_v60  ;;  %v150_v47 = vsel %vm584_vm3, 0, %v583_v55 }
  0x84   :  { %v408_v58 = vshrl.u32 %v768_v43, %v407_v60  ;;  %v411_v9 = vor.u32 %v410_v45, %v409_v32  ;;  %v414_v12 = vor.u32 %v413_v48, %v412_v34  ;;  %v417_v49 = vor.u32 %v416_v1, %v415_v50 }
  0x85   :  { %v352_v54 = vshll.u32 %v1054_v53, 30  ;;  %v587_v8 = vadd.s32 4294967294, %v252_v35  ;;  %v420_v15 = vor.u32 %v419_v36, %v418_v2  ;;  %v423_v16 = vor.u32 %v422_v63, %v421_v37 }
  0x86   :  { %vm424_vm4 = vcmp.lt.s32.totalorder %v405_v41, 1  ;;  %vm427_vm5 = vcmp.lt.s32.totalorder %v405_v41, 4  ;;  %v440_v18 = vshll.u32 %v400_v4, 8  ;;  %v135_v61 = vadd.s32 %v940_v59, %v937_v57 }
  0x87   :  { %v1067_v52 = vsub.s32 %v349_v56, %v352_v54  ;;  %vm426_vm6 = vcmp.lt.s32.totalorder %v405_v41, 3  ;;  %v429_v19 = vsel %vm427_vm5, %v417_v49, 2102212464  ;;  %v151_v20 = vsub.s32 32, %v150_v47 }
  0x88   :  { %v155_v43 = vsub.s32 4294967266, %v150_v47  ;;  %vm588_vm7 = vcmp.lt.s32.totalorder %v587_v8, 0  ;;  %vm425_vm8 = vcmp.lt.s32.totalorder %v405_v41, 2  ;;  %v428_v26 = vsel %vm424_vm4, %v408_v58, %v411_v9 }
  0x89   :  { %v355_v10 = vsub.s32 0, %v1067_v52  ;;  %v432_v27 = vsel %vm424_vm4, %v411_v9, %v414_v12  ;;  %v433_v28 = vsel %vm427_vm5, %v420_v15, 920167782  ;;  %v430_v30 = vsel %vm426_vm6, %v414_v12, %v429_v19 }
  0x8a   :  { %v434_v57 = vsel %vm426_vm6, %v417_v49, %v433_v28  ;;  %v436_v59 = vsel %vm424_vm4, %v414_v12, %v417_v49  ;;  %v437_v31 = vsel %vm427_vm5, %v423_v16, 1326507024  ;;  %v255_v51 = vsel %vm588_vm7, 0, %v587_v8 }
  0x8b   :  { %v590_v7 = vmin.u32 %v355_v10, %v1067_v52  ;;  %v435_v38 = vsel %vm425_vm8, %v432_v27, %v434_v57  ;;  %v438_v55 = vsel %vm426_vm6, %v420_v15, %v437_v31  ;;  %v156_v56 = vadd.s32 127, %v155_v43 }
  0x8c   :  { %v439_v39 = vsel %vm425_vm8, %v436_v59, %v438_v55  ;;  %v1086_v60 = vmul.u32.u64.low %v440_v18, %v435_v38  ;;  %v1087_v62 = vmul.u32.u64.high %v440_v18, %v435_v38, %v1086_v60  ;;  %v431_v0 = vsel %vm425_vm8, %v428_v26, %v430_v30 }
  0x8d   :  { %v357_v21 = vclz %v590_v7  ;;  %v1090_v32 = vmul.u32.u64.low %v440_v18, %v439_v39  ;;  %v1091_v34 = vmul.u32.u64.high %v440_v18, %v439_v39, %v1090_v32  ;;  %v260_v35 = vsub.s32 4294967266, %v255_v51 }
  0x8e   :  { %v345_v50 = vadd.s32 %v1026_v42, %v1039_v22  ;;  %v447_v1 = vmul.u32 %v440_v18, %v431_v0  ;;  %v450_v2 = vadd.s32 1, %v1087_v62  ;;  %v152_v36 = vshll.u32 %v1007_v44, %v150_v47 }
  0x8f   :  { %v591_v33 = vadd.s32 4294967294, %v357_v21  ;;  %v153_v4 = vshrl.u32 %v135_v61, %v151_v20  ;;  %v157_v37 = vshll.u32 %v156_v56, 23  ;;  %v240_v41 = vadd.s32 %v974_v25, %v980_v29 }
  0x90   :  { %v256_v8 = vsub.s32 32, %v255_v51  ;;  %v261_v58 = vadd.s32 127, %v260_v35  ;;  %vm449_vm10 = vc.u32 %v1091_v34, %v1086_v60  ;;  %v257_v44 = vshll.u32 %v1041_v23, %v255_v51 }
  0x91   :  { %vm592_vm9 = vcmp.lt.s32.totalorder %v591_v33, 0  ;;  %v451_v9 = vsel %vm449_vm10, %v450_v2, %v1087_v62  ;;  %v154_v49 = vor.u32 %v153_v4, %v152_v36  ;;  %v158_v15 = vor.u32 4788187, %v157_v37 }
  0x92   :  { %v360_v45 = vsel %vm592_vm9, 0, %v591_v33  ;;  %v452_v12 = vadd.s32 %v451_v9, %v447_v1  ;;  %v258_v47 = vshrl.u32 %v240_v41, %v256_v8  ;;  %v262_v16 = vshll.u32 %v261_v58, 23 }
  0x93   :  { %v365_v48 = vsub.s32 4294967266, %v360_v45  ;;  %v361_v54 = vsub.s32 32, %v360_v45  ;;  %v362_v42 = vshll.u32 %v1067_v52, %v360_v45  ;;  %v161_v7 = vcvt.s32.f32 %v154_v49 }
  0x94   :  { %v453_v18 = vadd.s32 536870912, %v452_v12  ;;  %v159_v19 = vand.u32 2147483647, %v158_v15  ;;  %v259_v20 = vor.u32 %v258_v47, %v257_v44  ;;  %v263_v43 = vor.u32 4788187, %v262_v16 }
  0x95   :  { %v366_v63 = vadd.s32 127, %v365_v48  ;;  %v363_v22 = vshrl.u32 %v345_v50, %v361_v54  ;;  %vm1109_vm12 = vcmp.le.f32.partialorder %v79_v17, 0.7853982  ;;  %vm291_vm13 = vcmp.lt.s32.totalorder %v855_v5, 0 }
  0x96   :  { %v1103_v29 = vshrl.u32 %v453_v18, 30  ;;  %v162_v28 = vmul.f32 %v161_v7, %v159_v19  ;;  %v264_v30 = vand.u32 2147483647, %v263_v43  ;;  %v266_v57 = vcvt.s32.f32 %v259_v20 }
  0x97   :  { %v367_v10 = vshll.u32 %v366_v63, 23  ;;  %v364_v61 = vor.u32 %v363_v22, %v362_v42  ;;  %v448_v32 = vadd.s32 %v1086_v60, %v1091_v34  ;;  %vm186_vm15 = vcmp.lt.s32.totalorder %v863_v11, 0 }
  0x98   :  { %v455_v52 = vshll.u32 %v1103_v29, 30  ;;  %v163_v51 = vxor.u32 2147483648, %v162_v28  ;;  %v267_v33 = vmul.f32 %v266_v57, %v264_v30  ;;  %vm1120_vm0 = vcmp.le.f32.partialorder %v289_v24, 0.7853982 }
  0x99   :  { %v368_v25 = vor.u32 4788187, %v367_v10  ;;  %v371_v26 = vcvt.s32.f32 %v364_v61  ;;  %vm1131_vm1 = vcmp.le.f32.partialorder %v184_v14, 0.7853982  ;;  %v165_v36 = vsub.s32 4, %v992_v40 }
  0x9a   :  { %v456_v27 = vsub.s32 %v452_v12, %v455_v52  ;;  %v164_v62 = vsel %vm81_vm11, %v163_v51, %v162_v28  ;;  %v268_v0 = vxor.u32 2147483648, %v267_v33  ;;  %v270_v14 = vsub.s32 4, %v1018_v6 }
  0x9b   :  { %v369_v21 = vand.u32 2147483647, %v368_v25  ;;  %v167_v60 = vsel %vm1109_vm12, %v865_v13, %v164_v62  ;;  %v166_v9 = vsel %vm81_vm11, %v165_v36, %v992_v40  ;;  %v375_v42 = vsub.s32 4, %v1054_v53 }
  0x9c   :  { %v458_v23 = vsub.s32 0, %v456_v27  ;;  %v269_v24 = vsel %vm186_vm15, %v268_v0, %v267_v33  ;;  %624 = vcosq.f32 %v167_v60  ;;  %v271_v10 = vsel %vm186_vm15, %v270_v14, %v1018_v6 }
  0x9d   :  { %v372_v59 = vmul.f32 %v371_v26, %v369_v21  ;;  %626 = vsinq.f32 %v167_v60  ;;  %v272_v41 = vsel %vm1131_vm1, %v863_v11, %v269_v24  ;;  %v168_v12 = vsel %vm1109_vm12, 0, %v166_v9 }
  0x9e   :  { %v594_v31 = vmin.u32 %v458_v23, %v456_v27  ;;  %v376_v15 = vsel %vm291_vm13, %v375_v42, %v1054_v53  ;;  %vm394_vm2 = vcmp.lt.s32.totalorder %v853_v3, 0  ;;  %v273_v40 = vsel %vm1131_vm1, 0, %v271_v10 }
  0x9f   :  { %v373_v55 = vxor.u32 2147483648, %v372_v59  ;;  %vm1162_vm3 = vcmp.le.f32.partialorder %v392_v46, 0.7853982  ;;  %v478_v47 = vsub.s32 4, %v1103_v29  ;;  %v172_v16 = vadd.s32 3, %v168_v12 }
  0xa0   :  { %v460_v38 = vclz %v594_v31  ;;  %v378_v61 = vsel %vm1120_vm0, 0, %v376_v15  ;;  %v277_v7 = vadd.s32 3, %v273_v40  ;;  %vm276_vm1 = vweird.f32 %v863_v11 }
  0xa1   :  { %v374_v45 = vsel %vm291_vm13, %v373_v55, %v372_v59  ;;  %v479_v46 = vsel %vm394_vm2, %v478_v47, %v1103_v29  ;;  %v173_v52 = vand.u32 3, %v172_v16  ;;  %v382_v21 = vand.u32 3, %v378_v61 }
  0xa2   :  { %v595_v56 = vadd.s32 4294967294, %v460_v38  ;;  %v377_v4 = vsel %vm1120_vm0, %v855_v5, %v374_v45  ;;  %v278_v28 = vand.u32 3, %v277_v7  ;;  %v481_v30 = vsel %vm1162_vm3, 0, %v479_v46 }
  0xa3   :  { %628 = vcosq.f32 %v377_v4  ;;  %vm178_vm4 = vcmp.eq.s32.totalorder %v173_v52, 2  ;;  %vm384_vm5 = vcmp.eq.s32.totalorder %v382_v21, 0  ;;  %vm387_vm6 = vcmp.eq.s32.totalorder %v382_v21, 2 }
  0xa4   :  { %vm596_vm14 = vcmp.lt.s32.totalorder %v595_v56, 0  ;;  %630 = vsinq.f32 %v377_v4  ;;  %v485_v33 = vand.u32 3, %v481_v30  ;;  %vm175_vm7 = vcmp.eq.s32.totalorder %v173_v52, 0 }
  0xa5   :  { %v463_v17 = vsel %vm596_vm14, 0, %v595_v56  ;;  %632 = vcosq.f32 %v272_v41  ;;  %vm280_vm8 = vcmp.eq.s32.totalorder %v278_v28, 0  ;;  %vm283_vm9 = vcmp.eq.s32.totalorder %v278_v28, 2 }
  0xa6   :  { %v464_v48 = vsub.s32 32, %v463_v17  ;;  %v465_v50 = vshll.u32 %v456_v27, %v463_v17  ;;  %v468_v54 = vsub.s32 4294967266, %v463_v17  ;;  %634 = vsinq.f32 %v272_v41  ;;  %v625_v18 = vpop.eup %624 }
  0xa7   :  { %v627_v25 = vpop.eup %626  ;;  %v179_v59 = vxor.u32 2147483648, %v625_v18  ;;  %vm383_vm10 = vcmp.lt.s32.totalorder %v382_v21, 2  ;;  %vm174_vm11 = vcmp.lt.s32.totalorder %v173_v52, 2  ;;  %vm279_vm12 = vcmp.lt.s32.totalorder %v278_v28, 2 }
  0xa8   :  { %v466_v1 = vshrl.u32 %v448_v32, %v464_v48  ;;  %v469_v2 = vadd.s32 127, %v468_v54  ;;  %v176_v31 = vxor.u32 2147483648, %v627_v25  ;;  %vm490_vm13 = vcmp.eq.s32.totalorder %v485_v33, 2 }
  0xa9   :  { %v180_v56 = vsel %vm178_vm4, %v179_v59, %v627_v25  ;;  %vm381_vm14 = vweird.f32 %v855_v5  ;;  %vm487_vm15 = vcmp.eq.s32.totalorder %v485_v33, 0  ;;  %vm171_vm0 = vweird.f32 %v865_v13 }
  0xaa   :  { %v467_v37 = vor.u32 %v466_v1, %v465_v50  ;;  %v470_v63 = vshll.u32 %v469_v2, 23  ;;  %v177_v62 = vsel %vm175_vm7, %v625_v18, %v176_v31 }
  0xab   :  { %v181_v50 = vsel %vm174_vm11, %v177_v62, %v180_v56 }
  0xac   :  { %v471_v8 = vor.u32 4788187, %v470_v63  ;;  %v474_v58 = vcvt.s32.f32 %v467_v37  ;;  %v182_v5 = vsel %vm171_vm0, nan, %v181_v50 }
  0xad   :  { %v629_v20 = vpop.eup %628  ;;  %v288_v37 = vmul.f32 %v182_v5, %v182_v5 }
  0xae   :  { %v472_v22 = vand.u32 2147483647, %v471_v8  ;;  %v631_v43 = vpop.eup %630  ;;  %v388_v23 = vxor.u32 2147483648, %v629_v20 }
  0xaf   :  { %v633_v26 = vpop.eup %632  ;;  %v385_v57 = vxor.u32 2147483648, %v631_v43 }
  0xb0   :  { %v475_v49 = vmul.f32 %v474_v58, %v472_v22  ;;  %v635_v27 = vpop.eup %634  ;;  %v284_v29 = vxor.u32 2147483648, %v633_v26  ;;  %v389_v55 = vsel %vm387_vm6, %v388_v23, %v631_v43 }
  0xb1   :  { %v281_v51 = vxor.u32 2147483648, %v635_v27  ;;  %v386_v38 = vsel %vm384_vm5, %v629_v20, %v385_v57  ;;  %v552_v57 = vlaneseq }
  0xb2   :  { %v476_v6 = vxor.u32 2147483648, %v475_v49  ;;  %v285_v32 = vsel %vm283_vm9, %v284_v29, %v635_v27  ;;  %v390_v17 = vsel %vm383_vm10, %v386_v38, %v389_v55 }
  0xb3   :  { %v282_v0 = vsel %vm280_vm8, %v633_v26, %v281_v51  ;;  %v391_v34 = vsel %vm381_vm14, nan, %v390_v17  ;;  %v553_v31 = vshrl.u32 %v552_v57, 7  ;;  %v555_v55 = vand.u32 127, %v552_v57 }
  0xb4   :  { %v477_v53 = vsel %vm394_vm2, %v476_v6, %v475_v49  ;;  %vm486_vm2 = vcmp.lt.s32.totalorder %v485_v33, 2  ;;  %v286_v54 = vsel %vm279_vm12, %v282_v0, %v285_v32 }
  0xb5   :  { %v480_v19 = vsel %vm1162_vm3, %v853_v3, %v477_v53  ;;  %vm484_vm3 = vweird.f32 %v853_v3  ;;  %v287_v2 = vsel %vm276_vm1, nan, %v286_v54  ;;  %v559_v56 = vmul.u32 128, %v553_v31 }
  0xb6   :  { %636 = vcosq.f32 %v480_v19 }
  0xb7   :  { %638 = vsinq.f32 %v480_v19  ;;  %v560_v0 = vadd.s32 %v559_v56, %v555_v55 }
  0xb9   :  { %vm561_vm9 = vcmp.lt.s32.totalorder %v560_v0, 8 }
  0xc0   :  { %v637_v39 = vpop.eup %636 }
  0xc1   :  { %v639_v35 = vpop.eup %638  ;;  %v491_v45 = vxor.u32 2147483648, %v637_v39 }
  0xc2   :  { %v488_v48 = vxor.u32 2147483648, %v639_v35 }
  0xc3   :  { %v492_v60 = vsel %vm490_vm13, %v491_v45, %v639_v35  ;;  %v550_v35 = vld [vmem:[#allocation8] sm:$0xff] }
  0xc4   :  { %v489_v24 = vsel %vm487_vm15, %v637_v39, %v488_v48 }
  0xc5   :  { %v493_v1 = vsel %vm486_vm2, %v489_v24, %v492_v60 }
  0xc6   :  { %v494_v36 = vsel %vm484_vm3, nan, %v493_v1 }
  0xc7   :  { %v495_v4 = vmul.f32 %v494_v36, %v391_v34 }
  0xc9   :  { %v496_v13 = vmul.f32 %v495_v4, %v287_v2 }
  0xcb   :  { %v497_v63 = vmul.f32 %v496_v13, %v287_v2 }
  0xcd   :  { %v498_v11 = vadd.f32 %v497_v63, %v288_v37 }
  0xcf   :  { %v500_v14 = vsub.f32 1.0, %v498_v11  ;;  %v499_v8 = vadd.f32 1e-06, %v498_v11 }
  0xd1   :  { %v501_v41 = vadd.f32 1e-06, %v500_v14 }
  0xd3   :  { %640 = vrcp.f32 %v501_v41 }
  0xdd   :  { %v641_v58 = vpop.eup %640 }
  0xde   :  { %v503_v9 = vmul.f32 %v641_v58, %v499_v8 }
  0xe0   :  { %642 = vrsqrt.f32 %v503_v9  ;;  %vm506_vm4 = vcmp.eq.f32.partialorder %v503_v9, inf  ;;  %v509_v42 = vand.u32 2147483648, %v503_v9  ;;  %vm508_vm5 = vcmp.eq.f32.partialorder %v503_v9, 0.0 }
  0xea   :  { %v643_v3 = vpop.eup %642 }
  0xeb   :  { %v505_v22 = vmul.f32 %v643_v3, %v503_v9 }
  0xed   :  { %v507_v10 = vsel %vm506_vm4, %v503_v9, %v505_v22 }
  0xee   :  { %v510_v12 = vsel %vm508_vm5, %v509_v42, %v507_v10 }
  0xef   :  { %v511_v49 = vand.u32 2147483647, %v510_v12  ;;  %vm538_vm7 = vcmp.eq.f32.partialorder %v510_v12, 0.0  ;;  %vm541_vm8 = vcmp.ne.f32.partialorder %v510_v12, %v510_v12  ;;  %v546_v33 = vand.u32 2147483648, %v510_v12 }
  0xf1   :  { %v513_v15 = vmax.f32 %v511_v49, 1.0  ;;  %v512_v40 = vmin.f32 %v511_v49, 1.0  ;;  %vm534_vm6 = vcmp.gt.f32.partialorder %v511_v49, 1.0 }
  0xf3   :  { %644 = vrcp.f32 %v513_v15 }
  0xfd   :  { %v645_v44 = vpop.eup %644 }
  0xfe   :  { %v515_v6 = vmul.f32 %v645_v44, %v512_v40 }
 0x100   :  { %v516_v47 = vmul.f32 %v515_v6, %v515_v6 }
 0x102   :  { %v517_v16 = vmul.f32 0.002785687, %v516_v47 }
 0x104   :  { %v518_v18 = vadd.f32 -0.015866, %v517_v16 }
 0x106   :  { %v519_v61 = vmul.f32 %v518_v18, %v516_v47 }
 0x108   :  { %v520_v53 = vadd.f32 0.04247222, %v519_v61 }
 0x10a   :  { %v521_v25 = vmul.f32 %v520_v53, %v516_v47 }
 0x10c   :  { %v522_v7 = vadd.f32 -0.074975304, %v521_v25 }
 0x10e   :  { %v523_v19 = vmul.f32 %v522_v7, %v516_v47 }
 0x110   :  { %v524_v20 = vadd.f32 0.1064488, %v523_v19 }
 0x112   :  { %v525_v46 = vmul.f32 %v524_v20, %v516_v47 }
 0x114   :  { %v526_v43 = vadd.f32 -0.14207031, %v525_v46 }
 0x116   :  { %v527_v52 = vmul.f32 %v526_v43, %v516_v47 }
 0x118   :  { %v528_v21 = vadd.f32 0.19993454, %v527_v52 }
 0x11a   :  { %v529_v26 = vmul.f32 %v528_v21, %v516_v47 }
 0x11c   :  { %v530_v27 = vadd.f32 -0.33333147, %v529_v26 }
 0x11e   :  { %v531_v28 = vmul.f32 %v530_v27, %v516_v47 }
 0x120   :  { %v532_v30 = vmul.f32 %v531_v28, %v515_v6 }
 0x122   :  { %v533_v23 = vadd.f32 %v532_v30, %v515_v6 }
 0x124   :  { %v535_v59 = vsub.f32 1.5707964, %v533_v23 }
 0x126   :  { %v536_v51 = vsel %vm534_vm6, %v535_v59, %v533_v23 }
 0x127   :  { %v539_v29 = vsel %vm538_vm7, 0.0, %v536_v51 }
 0x128   :  { %v543_v38 = vsel %vm541_vm8, nan, %v539_v29 }
 0x129   :  { %v545_v39 = vand.u32 2147483647, %v543_v38 }
 0x12b   :  { %v547_v62 = vor.u32 %v546_v33, %v545_v39 }
 0x12d   :  { %v548_v32 = vmul.f32 2.0, %v547_v62 }
 0x12f   :  { %v549_v17 = vmul.f32 6371.0, %v548_v32 }
 0x131   :  { %v551_v45 = vmul.f32 %v550_v35, %v549_v17 }
 0x133   :  { %v562_v48 = vsel %vm561_vm9, %v551_v45, inf }
 0x134   :  { %563 = vst [vmem:[#allocation10] sm:$0xff] %v562_v48 }
 0x135   :  { %745 = shalt.err (!%p742_p8)
}
 0x136   :  { %s746_s17 = scalar_lea.hbm %s1198_s5, 128 }
 0x137   :  { %p747_p9 = scmp.ne.s32.totalorder %s1198_s5, %s746_s17  ;;  %p750_p10 = scmp.lt.u32.totalorder %s746_s17, %s1198_s5 }
 0x139   :  { %p752_p11 = pnand %p750_p10, %p747_p9 }
 0x13b   :  { %755 = shalt.err (!%p752_p11)
}
 0x13c   :  { %573 = dma.vmem_to_hbm [thread:$0]  %s571_s4, 128, %s1198_s5, [#allocation4]  }
 0x13d   :  { %762 = dma.done.wait [#allocation4], 128  }
 0x13e   :  { %763 = vsyncadd [#allocation4], 4294967168 }
 0x13f   :  { %577 = vsyncpa [#allocation3], 1 }
 0x140   :  { %578 = vsyncpa [#allocation6], 1 }
 0x141   :  { %579 = vsyncpa [#allocation9], 1 }
 0x142   :  { %580 = vsyncpa [#allocation4], 1 }

</bundles_post_ra>
